<compile_context>
chip_gen: v5e
topology: v5e:2x2
jax: 0.10.0
libtpu: 0.0.40
codegen_flags: <defaults>
</compile_context>

<pallas_src>
import functools

import jax
import jax.numpy as jnp
from jax.experimental import pallas as pl
from jax.experimental.pallas import tpu as pltpu

BN_EPS = 1e-5


# ---------------------------------------------------------------------------
# Stage 1: r = relu(x @ w1 + b1)  (stored as r_dtype, default bf16)
#          + per-tile partial batch statistics packed into an (8, H) block:
#            row 0 = sum(r), row 1 = sum(r^2), rows 2..7 = 0.
# No cross-tile state -> the grid axis is "parallel" (megacore-friendly).
# ---------------------------------------------------------------------------
def _stage1_kernel(x_ref, w1_ref, b1_ref, r_ref, stats_ref, *, use_bf16_mxu):
    x = x_ref[...]
    w1 = w1_ref[...]
    if use_bf16_mxu:
        # In-kernel cast: HBM read stays at 4 B/elem, MXU runs the bf16 path.
        x = x.astype(jnp.bfloat16)
        w1 = w1.astype(jnp.bfloat16)

    h = jnp.dot(x, w1, preferred_element_type=jnp.float32)        # [TN, H] f32
    r = jnp.maximum(h + b1_ref[...], 0.0)                         # ReLU
    r_ref[...] = r.astype(r_ref.dtype)

    # Stats from the f32 result (before any bf16 rounding of the stored r).
    s = jnp.sum(r, axis=0, keepdims=True)                         # [1, H]
    q = jnp.sum(r * r, axis=0, keepdims=True)                     # [1, H]
    row = jax.lax.broadcasted_iota(jnp.int32, (8, r.shape[1]), 0)
    stats_ref[0] = jnp.where(row == 0, s, 0.0) + jnp.where(row == 1, q, 0.0)


# ---------------------------------------------------------------------------
# Stage 2: reduce the per-tile stat partials, fold BatchNorm into Linear2,
# and emit a lane-dense (1, tile_n) output row:
#     out = w2_eff @ r^T + b2_eff   (transposed-RHS MXU dot)
# The per-step fold work is a handful of [1, H] VPU/EUP ops (negligible).
# ---------------------------------------------------------------------------
def _stage2_kernel(stats_ref, gamma_ref, beta_ref, w2row_ref, b2_ref, r_ref,
                   o_ref, *, batch_n):
    tot = jnp.sum(stats_ref[...], axis=0)                         # [8, H]
    ssum = tot[0:1, :]                                            # [1, H]
    ssq = tot[1:2, :]                                             # [1, H]

    inv_n = 1.0 / batch_n
    mean = ssum * inv_n
    var = jnp.maximum(ssq * inv_n - mean * mean, 0.0)             # biased var
    scale = gamma_ref[...] * jax.lax.rsqrt(var + BN_EPS)          # [1, H]
    shift = beta_ref[...] - mean * scale                          # [1, H]
    w2eff = w2row_ref[...] * scale                                # [1, H]
    b2eff = b2_ref[0, 0] + jnp.sum(shift * w2row_ref[...])        # scalar (SMEM b2)

    r = r_ref[...].astype(jnp.float32)                            # [TN, H]
    out = jax.lax.dot_general(                                    # [1, TN]
        w2eff, r, dimension_numbers=(((1,), (1,)), ((), ())),
        preferred_element_type=jnp.float32)
    o_ref[...] = out + b2eff


def nn_forward(x, w1, b1, gamma, beta, w2, b2, *,
               tile_n=1024, r_dtype=jnp.bfloat16, use_bf16_mxu=False):
    """x: [N, D] float32 -> [N, 1] float32.

    tile_n:  rows per grid step.  Pick the largest multiple of 128 such that the
             double-buffered tiles fit the VMEM budget (~48 MiB cap for v7x).
    r_dtype: storage dtype of the intermediate activation r (bf16 halves the
             dominant HBM round-trip; use float32 for bit-level parity).
    use_bf16_mxu: cast x/w1 to bf16 INSIDE the kernel for the Linear1 MXU dot.
    """
    N, D = x.shape
    H = w1.shape[1]
    tile_n = min(tile_n, N)
    assert N % tile_n == 0, "wrapper assumes N divisible by tile_n"
    assert tile_n == N or tile_n % 128 == 0, (
        "lane-dense (1, tile_n) output block requires tile_n % 128 == 0")
    num_tiles = N // tile_n

    # Rough per-step VMEM estimate (double-buffered ins/outs + f32 temporaries),
    # used to size the scoped-VMEM limit; capped at ~48 MiB (v7x has 64 MiB).
    r_bytes = jnp.dtype(r_dtype).itemsize
    est = (2 * (tile_n * D * 4 + tile_n * H * r_bytes + 8 * H * 4)   # x, r, stats
           + 2 * (D * H * 4 + H * 4)                                 # w1, b1
           + 2 * tile_n * H * 4                                      # f32 h/r temps
           + 2 * tile_n * 4                                          # out row blocks
           + num_tiles * 8 * H * 4)                                  # resident stats
    vmem_limit = int(min(max(3 * est, 32 * 2 ** 20), 48 * 2 ** 20))

    def resident(shape):  # whole array, same block every grid step
        return pl.BlockSpec(shape, lambda i, _s=shape: (0,) * len(_s))

    # ----- Stage 1: activations + per-tile batch-stat partials -------------
    r, stats = pl.pallas_call(
        functools.partial(_stage1_kernel, use_bf16_mxu=use_bf16_mxu),
        out_shape=(
            jax.ShapeDtypeStruct((N, H), r_dtype),
            jax.ShapeDtypeStruct((num_tiles, 8, H), jnp.float32),
        ),
        grid=(num_tiles,),
        in_specs=[
            pl.BlockSpec((tile_n, D), lambda i: (i, 0)),   # x tile
            resident((D, H)),                              # w1 (VMEM resident)
            resident((1, H)),                              # b1 (VMEM resident)
        ],
        out_specs=(
            pl.BlockSpec((tile_n, H), lambda i: (i, 0)),   # r tile
            pl.BlockSpec((1, 8, H), lambda i: (i, 0, 0)),  # stat partials
        ),
        compiler_params=pltpu.CompilerParams(
            dimension_semantics=("parallel",),             # no cross-tile state
            vmem_limit_bytes=vmem_limit),
    )(x, w1, b1)

    w2row = jnp.reshape(w2, (1, H))   # [H,1] -> [1,H] row (tiny, outside kernels)

    # ----- Stage 2: BN fold + out = r @ w2_eff + b2_eff, lane-dense output --
    out_row = pl.pallas_call(
        functools.partial(_stage2_kernel, batch_n=float(N)),
        out_shape=jax.ShapeDtypeStruct((1, N), jnp.float32),
        grid=(num_tiles,),
        in_specs=[
            resident((num_tiles, 8, H)),                           # stat partials
            resident((1, H)),                                      # gamma
            resident((1, H)),                                      # beta
            resident((1, H)),                                      # w2 row
            pl.BlockSpec(memory_space=pltpu.MemorySpace.SMEM),     # b2 scalar
            pl.BlockSpec((tile_n, H), lambda i: (i, 0)),           # r tile
        ],
        out_specs=pl.BlockSpec((1, tile_n), lambda i: (0, i)),     # lane-dense row
        compiler_params=pltpu.CompilerParams(
            dimension_semantics=("parallel",),
            vmem_limit_bytes=vmem_limit),
    )(stats, gamma, beta, w2row, b2, r)

    return out_row.reshape(N, 1)


def init_params(key, D, hidden):
    """Deterministic init mimicking PyTorch defaults (uniform +/- 1/sqrt(fan_in))."""
    k1, k2, k3, k4 = jax.random.split(key, 4)
    bound1 = 1.0 / (D ** 0.5)
    w1 = jax.random.uniform(k1, (D, hidden), jnp.float32, -bound1, bound1)
    b1 = jax.random.uniform(k2, (1, hidden), jnp.float32, -bound1, bound1)
    bound2 = 1.0 / (hidden ** 0.5)
    w2 = jax.random.uniform(k3, (hidden, 1), jnp.float32, -bound2, bound2)
    b2 = jax.random.uniform(k4, (1, 1), jnp.float32, -bound2, bound2)
    gamma = jnp.ones((1, hidden), jnp.float32)   # BatchNorm weight
    beta = jnp.zeros((1, hidden), jnp.float32)   # BatchNorm bias
    return w1, b1, gamma, beta, w2, b2


def reference_forward(x, w1, b1, gamma, beta, w2, b2):
    """Pure-JAX reference (PyTorch training-mode BatchNorm semantics)."""
    h = x @ w1 + b1
    r = jnp.maximum(h, 0.0)
    mean = jnp.mean(r, axis=0, keepdims=True)
    var = jnp.mean((r - mean) ** 2, axis=0, keepdims=True)
    y = (r - mean) / jnp.sqrt(var + BN_EPS) * gamma + beta
    return y @ w2 + b2


if __name__ == "__main__":
    N, D, HIDDEN = 512, 32, 16          # small but multi-tile (4 batch tiles)

    key = jax.random.PRNGKey(0)
    kx, kp = jax.random.split(key)
    x = jax.random.normal(kx, (N, D), jnp.float32)
    params = init_params(kp, D, HIDDEN)
    ref = reference_forward(x, *params)

    # Default path: bf16 intermediate activations (halved HBM round-trip).
    out_bf16 = jax.block_until_ready(nn_forward(x, *params, tile_n=128))
    assert out_bf16.shape == (N, 1)
    err_bf16 = float(jnp.max(jnp.abs(out_bf16 - ref)))
    assert err_bf16 < 5e-2, f"bf16-activation path mismatch: max abs err {err_bf16}"

    # Full-f32 path: near bit-level parity with the reference math.
    out_f32 = jax.block_until_ready(
        nn_forward(x, *params, tile_n=128, r_dtype=jnp.float32))
    err_f32 = float(jnp.max(jnp.abs(out_f32 - ref)))
    assert jnp.allclose(out_f32, ref, atol=1e-3, rtol=1e-3), \
        f"f32 path mismatch: max abs err {err_f32}"

    print("KERNEL_OK")
</pallas_src>

<mosaic_0001>
module attributes {stable_mosaic.version = 11 : i64} {
  func.func @_stage1_kernel(%arg0: i32, %arg1: memref<128x32xf32, #tpu.memory_space<vmem>>, %arg2: memref<32x16xf32, #tpu.memory_space<vmem>>, %arg3: memref<1x16xf32, #tpu.memory_space<vmem>>, %arg4: memref<128x16xbf16, #tpu.memory_space<vmem>>, %arg5: memref<1x8x16xf32, #tpu.memory_space<vmem>>) attributes {dimension_semantics = [#tpu.dimension_semantics<parallel>], iteration_bounds = array<i64: 4>, scalar_prefetch = 0 : i64, scratch_operands = 0 : i64, tpu.core_type = #tpu.core_type<tc>, window_params = [{transform_indices = @transform_0, window_bounds = array<i64: 128, 32>}, {pipeline_mode = #tpu.pipeline_mode<synchronous>, transform_indices = @transform_1, window_bounds = array<i64: 32, 16>}, {pipeline_mode = #tpu.pipeline_mode<synchronous>, transform_indices = @transform_2, window_bounds = array<i64: 1, 16>}, {transform_indices = @transform_3, window_bounds = array<i64: 128, 16>}, {transform_indices = @transform_4, window_bounds = array<i64: 1, 8, 16>}]} {
    %c0 = arith.constant 0 : index
    %c0_0 = arith.constant 0 : index
    %0 = vector.load %arg1[%c0, %c0_0] : memref<128x32xf32, #tpu.memory_space<vmem>>, vector<128x32xf32>
    %c0_1 = arith.constant 0 : index
    %c0_2 = arith.constant 0 : index
    %1 = vector.load %arg2[%c0_1, %c0_2] : memref<32x16xf32, #tpu.memory_space<vmem>>, vector<32x16xf32>
    %cst = arith.constant dense<0.000000e+00> : vector<128x16xf32>
    %2 = tpu.matmul %0, %1, %cst {dimension_numbers = #tpu.dot_dimension_numbers<[1], [0], [0], [1], [0, 0, 1, 1], [], []>} : vector<128x32xf32>, vector<32x16xf32>, vector<128x16xf32> -> vector<128x16xf32>
    %c0_3 = arith.constant 0 : index
    %c0_4 = arith.constant 0 : index
    %3 = vector.load %arg3[%c0_3, %c0_4] : memref<1x16xf32, #tpu.memory_space<vmem>>, vector<1x16xf32>
    %4 = vector.broadcast %3 : vector<1x16xf32> to vector<128x16xf32>
    %5 = arith.addf %2, %4 : vector<128x16xf32>
    %cst_5 = arith.constant 0.000000e+00 : f32
    %6 = vector.broadcast %cst_5 : f32 to vector<128x16xf32>
    %7 = arith.maximumf %5, %6 : vector<128x16xf32>
    %8 = arith.truncf %7 : vector<128x16xf32> to vector<128x16xbf16>
    %c0_6 = arith.constant 0 : index
    %c0_7 = arith.constant 0 : index
    %9 = vector.load %arg4[%c0_6, %c0_7] : memref<128x16xbf16, #tpu.memory_space<vmem>>, vector<128x16xbf16>
    tpu.vector_store %arg4[%c0_6, %c0_7], %8 {strides = array<i32>} : memref<128x16xbf16, #tpu.memory_space<vmem>>, vector<128x16xbf16>,
    %cst_8 = arith.constant dense<0.000000e+00> : vector<16xf32>
    %10 = vector.multi_reduction <add>, %7, %cst_8 [0] : vector<128x16xf32> to vector<16xf32>
    %11 = vector.shape_cast %10 : vector<16xf32> to vector<1x16xf32>
    %12 = arith.mulf %7, %7 : vector<128x16xf32>
    %cst_9 = arith.constant dense<0.000000e+00> : vector<16xf32>
    %13 = vector.multi_reduction <add>, %12, %cst_9 [0] : vector<128x16xf32> to vector<16xf32>
    %14 = vector.shape_cast %13 : vector<16xf32> to vector<1x16xf32>
    %15 = tpu.iota {dimensions = array<i32: 0>} : vector<8x16xi32>
    %c0_i32 = arith.constant 0 : i32
    %16 = vector.broadcast %c0_i32 : i32 to vector<8x16xi32>
    %17 = arith.cmpi eq, %15, %16 : vector<8x16xi32>
    %cst_10 = arith.constant 0.000000e+00 : f32
    %18 = vector.shape_cast %11 : vector<1x16xf32> to vector<1x16xf32>
    %19 = vector.broadcast %18 : vector<1x16xf32> to vector<8x16xf32>
    %20 = vector.broadcast %cst_10 : f32 to vector<8x16xf32>
    %21 = arith.select %17, %19, %20 : vector<8x16xi1>, vector<8x16xf32>
    %c1_i32 = arith.constant 1 : i32
    %22 = vector.broadcast %c1_i32 : i32 to vector<8x16xi32>
    %23 = arith.cmpi eq, %15, %22 : vector<8x16xi32>
    %cst_11 = arith.constant 0.000000e+00 : f32
    %24 = vector.shape_cast %14 : vector<1x16xf32> to vector<1x16xf32>
    %25 = vector.broadcast %24 : vector<1x16xf32> to vector<8x16xf32>
    %26 = vector.broadcast %cst_11 : f32 to vector<8x16xf32>
    %27 = arith.select %23, %25, %26 : vector<8x16xi1>, vector<8x16xf32>
    %28 = arith.addf %21, %27 : vector<8x16xf32>
    %c0_12 = arith.constant 0 : index
    %c0_13 = arith.constant 0 : index
    %c0_14 = arith.constant 0 : index
    %29 = vector.load %arg5[%c0_12, %c0_13, %c0_14] : memref<1x8x16xf32, #tpu.memory_space<vmem>>, vector<1x8x16xf32>
    %30 = vector.shape_cast %29 : vector<1x8x16xf32> to vector<8x16xf32>
    %31 = vector.shape_cast %28 : vector<8x16xf32> to vector<1x8x16xf32>
    tpu.vector_store %arg5[%c0_12, %c0_13, %c0_14], %31 {strides = array<i32>} : memref<1x8x16xf32, #tpu.memory_space<vmem>>, vector<1x8x16xf32>,
    return
  }
  func.func @transform_0(%arg0: i32) -> (i32, i32) {
    %c0_i32 = arith.constant 0 : i32
    %c0_i32_0 = arith.constant 0 : i32
    return %arg0, %c0_i32 : i32, i32
  }
  func.func @transform_1(%arg0: i32) -> (i32, i32) {
    %c0_i32 = arith.constant 0 : i32
    %c0_i32_0 = arith.constant 0 : i32
    %c0_i32_1 = arith.constant 0 : i32
    return %c0_i32, %c0_i32_0 : i32, i32
  }
  func.func @transform_2(%arg0: i32) -> (i32, i32) {
    %c0_i32 = arith.constant 0 : i32
    %c0_i32_0 = arith.constant 0 : i32
    %c0_i32_1 = arith.constant 0 : i32
    return %c0_i32, %c0_i32_0 : i32, i32
  }
  func.func @transform_3(%arg0: i32) -> (i32, i32) {
    %c0_i32 = arith.constant 0 : i32
    %c0_i32_0 = arith.constant 0 : i32
    return %arg0, %c0_i32 : i32, i32
  }
  func.func @transform_4(%arg0: i32) -> (i32, i32, i32) {
    %c0_i32 = arith.constant 0 : i32
    %c0_i32_0 = arith.constant 0 : i32
    %c0_i32_1 = arith.constant 0 : i32
    return %arg0, %c0_i32, %c0_i32_0 : i32, i32, i32
  }
}

</mosaic_0001>

<bundles_post_ra>
// kernel: tpu_custom_call.1
= control target key start
LH: loop header
LB: loop body
LE: loop exit
PB: predicated region body
PF: predicated region fallthrough
CT: control target
= control target key end

     0   :  { %10 = vsyncpa [#allocation3], 0  ;;  %s1058_s0 = inlined_call_operand.vmem [shape: f32[512,32], index: 0, kind: input, shape index: {}]   ;;  %s1059_s1 = inlined_call_operand.vmem [shape: f32[32,16], index: 1, kind: input, shape index: {}]   ;;  %s1060_s2 = inlined_call_operand.vmem [shape: f32[1,16], index: 2, kind: input, shape index: {}]   ;;  %s1061_s3 = inlined_call_operand.vmem [shape: bf16[512,16], index: 3, kind: output, shape index: {0}]   ;;  %s1062_s4 = inlined_call_operand.hbm [shape: f32[4,8,16], index: 4, kind: output, shape index: {1}]  }
   0x1   :  { %12 = vsyncpa [#allocation3 + $0x1], 0  ;;  %s777_s15 = smov 0   ;;  %s779_s16 = smov 0  }
   0x2   :  { %s781_s17 = smov 0   ;;  %s783_s18 = smov 0  }
   0x3 LB: > { %s798_s19 = sadd.s32 4294967295, %s750_s18   ;;  %s607_s20 = sadd.s32 4294967294, %s750_s18   ;;  %s750_s18 = sphi %s783_s18, %s1068_s18   ;;  %s746_s17 = sphi %s781_s17, %s1067_s17   ;;  %s742_s16 = sphi %s779_s16, %s1066_s16   ;;  %s738_s15 = sphi %s777_s15, %s1065_s15  }
   0x4   : > { %s802_s21 = sadd.s32 1, %s750_s18   ;;  %s119_s22 = sadd.s32 1, %s746_s17 }
   0x5   : > { %s116_s23 = ssub.s32 %s750_s18, %s802_s21  ;;  %p129_p0 = scmp.ne.s32.totalorder %s746_s17, %s742_s16 }
   0x6   : > { %p117_p1 = scmp.eq.s32.totalorder %s116_s23, 0  ;;  %p130_p2 = scmp.eq.s32.totalorder %s798_s19, 3 }
   0x7   : > { %p135_p3 = scmp.ne.s32.totalorder %s742_s16, %s738_s15  ;;  %p136_p4 = scmp.eq.s32.totalorder %s607_s20, 3 }
   0x8   : > { %s813_s24 = scalar_select %p117_p1, %s746_s17, %s119_s22  }
   0x9   : > { %p815_p5 = por %p130_p2, %p129_p0  ;;  %p819_p6 = por %p136_p4, %p135_p3 }
   0xa   : > { %p610_p7 = scmp.ge.s32.totalorder %s750_s18, 1  ;;  %p169_p8 = scmp.lt.s32.totalorder %s750_s18, 5 }
   0xc   : > { %p170_p9 = pnand %p610_p7, %p169_p8 }
   0xd   : > { %s612_s5 = sshll.u32 (!%p170_p9), %s798_s19, 4  ;;  %s197_s29 = sand.u32 (!%p170_p9), 1, %s742_s16  }
   0xe   : > { %173 = sbr.rel (%p170_p9) target bundleno = 228 (0xe4), region = 32  ;;  %p201_p10 = scmp.lt.s32.totalorder (!%p170_p9), %s612_s5, 63 }
   0xf   : > { %s611_s30 = sshll.u32 (!%p170_p9), %s197_s29, 3 }
  0x10   : > { %s199_s9 = scalar_lea.vmem (!%p170_p9), [#allocation2], %s611_s30 }
  0x13   : > { %v231_v0 = vld [vmem:[%s1059_s1 + $0x18] sm:$0xff]  ;;  %v230_v1 = vld [vmem:[%s1059_s1 + $0x10] sm:$0xff]  ;;  %v229_v2 = vld [vmem:[%s1059_s1 + $0x8] sm:$0xff]  ;;  %s1070_s5 = smov (!%p201_p10, %s612_s5), 63  ;;  %vm236_vm0 = vcmask 261120   ;;  %vm382_vm1 = vcmask 125952  }
  0x14   : > { %297 = vmatpush.msra.mxu0 %v231_v0  ;;  %636 = vmatpush.msra.mxu1 %v231_v0  ;;  %v228_v3 = vld [vmem:[%s1059_s1] sm:$0xff]  ;;  %s613_s10 = sshll.u32 %s1070_s5, 3  ;;  %s615_s22 = sshll.u32 %s1070_s5, 2  ;;  %vm399_vm2 = vcmask 130048  }
  0x15   : > { %637 = vmatpush.msra.mxu2 %v231_v0  ;;  %638 = vmatpush.msra.mxu3 %v231_v0  ;;  %s844_s13 = scalar_lea.vmem %s1058_s0, %s613_s10  ;;  %v881_v20 = vld [vmem:[%s1060_s2] ss:$0 sm:$0xff]  ;;  %s891_s28 = scalar_lea.vmem %s1061_s3, %s615_s22 }
  0x16   : > { %298 = vmatpush.msra.mxu0 %v230_v1  ;;  %639 = vmatpush.msra.mxu1 %v230_v1  ;;  %v212_v4 = vld [vmem:[%s844_s13] sm:$0xff]  ;;  %v213_v8 = vld [vmem:[%s844_s13 + $0x8] sm:$0xff]  ;;  %v214_v12 = vld [vmem:[%s844_s13 + $0x10] sm:$0xff]  ;;  %s633_s5 = sshll.u32 %s798_s19, 3  ;;  %s520_s10 = sshll.u32 %s199_s9, 4  ;;  %s521_s10 = int_to_ptr.vmem [resolvable:$true] %s520_s10 }
  0x17   : > { %640 = vmatpush.msra.mxu2 %v230_v1  ;;  %641 = vmatpush.msra.mxu3 %v230_v1  ;;  %v216_v5 = vld [vmem:[%s844_s13 + $0x20] sm:$0xff]  ;;  %v217_v9 = vld [vmem:[%s844_s13 + $0x28] sm:$0xff]  ;;  %v218_v13 = vld [vmem:[%s844_s13 + $0x30] sm:$0xff]  ;;  %s518_s8 = scalar_lea.hbm %s1062_s4, %s633_s5  ;;  %s504_s19 = scalar_lea.sflag [#allocation3], %s197_s29 }
  0x18   : > { %299 = vmatpush.msra.mxu0 %v229_v2  ;;  %642 = vmatpush.msra.mxu1 %v229_v2  ;;  %v220_v6 = vld [vmem:[%s844_s13 + $0x40] sm:$0xff]  ;;  %v221_v10 = vld [vmem:[%s844_s13 + $0x48] sm:$0xff]  ;;  %v222_v14 = vld [vmem:[%s844_s13 + $0x50] sm:$0xff]  ;;  %s522_s11 = sshll.u32 %s518_s8, 4  ;;  %s708_s22 = scalar_lea.hbm %s1062_s4, 32  ;;  %s523_s11 = int_to_ptr.hbm [resolvable:$true] %s522_s11 }
  0x19   : > { %643 = vmatpush.msra.mxu2 %v229_v2  ;;  %644 = vmatpush.msra.mxu3 %v229_v2  ;;  %v224_v7 = vld [vmem:[%s844_s13 + $0x60] sm:$0xff]  ;;  %v225_v11 = vld [vmem:[%s844_s13 + $0x68] sm:$0xff]  ;;  %v226_v15 = vld [vmem:[%s844_s13 + $0x70] sm:$0xff]  ;;  %s702_s12 = sshra.s32 %s523_s11, 4  ;;  %s703_s12 = int_to_ptr.hbm [resolvable:$true] %s702_s12 }
  0x1a   : > { %300 = vmatpush.msra.mxu0 %v228_v3  ;;  %645 = vmatpush.msra.mxu1 %v228_v3  ;;  %v215_v16 = vld [vmem:[%s844_s13 + $0x18] sm:$0xff]  ;;  %p709_p0 = scmp.lt.s32.totalorder %s703_s12, %s1062_s4 }
  0x1b   : > { %616 = vmatmul.msk.f32.vlgmr.msra.gmra.mxu0 %vm236_vm0, %v212_v4  ;;  %620 = vmatmul.msk.f32.vlgmr.msra.gmra.mxu1 %vm236_vm0, %v216_v5  ;;  %v219_v17 = vld [vmem:[%s844_s13 + $0x38] sm:$0xff] }
  0x1c   : > { %646 = vmatpush.msra.mxu2 %v228_v3  ;;  %647 = vmatpush.msra.mxu3 %v228_v3  ;;  %v223_v18 = vld [vmem:[%s844_s13 + $0x58] sm:$0xff] }
  0x1d   : > { %624 = vmatmul.msk.f32.vlgmr.msra.gmra.mxu2 %vm236_vm0, %v220_v6  ;;  %628 = vmatmul.msk.f32.vlgmr.msra.gmra.mxu3 %vm236_vm0, %v224_v7  ;;  %v227_v19 = vld [vmem:[%s844_s13 + $0x78] sm:$0xff]  ;;  %s704_s13 = scalar_lea.hbm %s703_s12, 8 }
  0x1e   : > { %p705_p11 = scmp.ne.s32.totalorder %s703_s12, %s704_s13  ;;  %p710_p1 = scmp.lt.s32.totalorder %s708_s22, %s704_s13 }
  0x20   : > { %p706_p12 = pnand %p705_p11, %p815_p5  ;;  %p711_p2 = por %p710_p1, %p709_p0 }
  0x22   : > { %p707_p13 = pneg %p706_p12 }
  0x23   : > { %617 = vmatmul.msk.f32.gmra.mxu0 %vm236_vm0, %v213_v8  ;;  %621 = vmatmul.msk.f32.gmra.mxu1 %vm236_vm0, %v217_v9 }
  0x24   : > { %p712_p3 = pnand %p711_p2, %p707_p13 }
  0x25   : > { %625 = vmatmul.msk.f32.gmra.mxu2 %vm236_vm0, %v221_v10  ;;  %629 = vmatmul.msk.f32.gmra.mxu3 %vm236_vm0, %v225_v11 }
  0x2b   : > { %618 = vmatmul.msk.f32.gmra.mxu0 %vm236_vm0, %v214_v12  ;;  %622 = vmatmul.msk.f32.gmra.mxu1 %vm236_vm0, %v218_v13 }
  0x2d   : > { %626 = vmatmul.msk.f32.gmra.mxu2 %vm236_vm0, %v222_v14  ;;  %630 = vmatmul.msk.f32.gmra.mxu3 %vm236_vm0, %v226_v15 }
  0x33   : > { %619 = vmatmul.msk.f32.gmra.mxu0 %vm236_vm0, %v215_v16  ;;  %623 = vmatmul.msk.f32.gmra.mxu1 %vm236_vm0, %v219_v17 }
  0x35   : > { %627 = vmatmul.msk.f32.gmra.mxu2 %vm236_vm0, %v223_v18  ;;  %631 = vmatmul.msk.f32.gmra.mxu3 %vm236_vm0, %v227_v19 }
  0x98   : > { %v302_v21 = vpop.f32.mrf.mxu0  ;;  %v314_v22 = vpop.f32.mrf.mxu1 }
  0x99   : > { %v303_v23 = vadd.f32 %v881_v20, %v302_v21  ;;  %v315_v24 = vadd.f32 %v881_v20, %v314_v22 }
  0x9b   : > { %v350_v25 = vmax.f32 %v303_v23, 0.0  ;;  %v886_v26 = vmax.f32 %v315_v24, 0.0 }
  0x9d   : > { %v366_v27 = vpack.c.bf16 %v350_v25, %v350_v25  ;;  %v370_v28 = vpack.c.bf16 %v886_v26, %v886_v26  ;;  %v437_v61 = vmul.f32 %v350_v25, %v350_v25  ;;  %v400_v1 = vsel %vm399_vm2, %v350_v25, 0.0 }
  0x9e   : > { %v441_v11 = vmul.f32 %v886_v26, %v886_v26 }
  0x9f   : > { %383 = vst.msk [vmem:[%s891_s28] sm:$0xf] %vm382_vm1, %v366_v27  ;;  %v453_v14 = vsel %vm399_vm2, %v437_v61, 0.0 }
  0xa0   : > { %v305_v29 = vpop.f32.mrf.mxu0  ;;  %387 = vst.msk [vmem:[%s891_s28 + $0x10] sm:$0xf] %vm382_vm1, %v370_v28  ;;  %v317_v30 = vpop.f32.mrf.mxu1 }
  0xa1   : > { %v306_v31 = vadd.f32 %v881_v20, %v305_v29  ;;  %v318_v32 = vadd.f32 %v881_v20, %v317_v30  ;;  %v326_v33 = vpop.f32.mrf.mxu2  ;;  %v338_v34 = vpop.f32.mrf.mxu3 }
  0xa2   : > { %v327_v35 = vadd.f32 %v881_v20, %v326_v33  ;;  %v339_v36 = vadd.f32 %v881_v20, %v338_v34 }
  0xa3   : > { %v351_v37 = vmax.f32 %v306_v31, 0.0  ;;  %v903_v38 = vmax.f32 %v318_v32, 0.0  ;;  %v407_v31 = vsel %vm399_vm2, %v886_v26, 0.0 }
  0xa4   : > { %v905_v39 = vmax.f32 %v327_v35, 0.0  ;;  %v907_v40 = vmax.f32 %v339_v36, 0.0 }
  0xa5   : > { %v367_v41 = vpack.c.bf16 %v351_v37, %v351_v37  ;;  %v371_v42 = vpack.c.bf16 %v903_v38, %v903_v38  ;;  %v438_v57 = vmul.f32 %v351_v37, %v351_v37  ;;  %v401_v62 = vsel %vm399_vm2, %v351_v37, 0.0 }
  0xa6   : > { %v374_v43 = vpack.c.bf16 %v905_v39, %v905_v39  ;;  %v378_v44 = vpack.c.bf16 %v907_v40, %v907_v40  ;;  %v402_v10 = vadd.f32 %v401_v62, %v400_v1  ;;  %v442_v32 = vmul.f32 %v903_v38, %v903_v38 }
  0xa7   : > { %384 = vst.msk [vmem:[%s891_s28 + $0x4] sm:$0xf] %vm382_vm1, %v367_v41  ;;  %v454_v4 = vsel %vm399_vm2, %v438_v57, 0.0  ;;  %v460_v37 = vsel %vm399_vm2, %v441_v11, 0.0  ;;  %v409_v26 = vsel %vm399_vm2, %v903_v38, 0.0 }
  0xa8   : > { %v308_v45 = vpop.f32.mrf.mxu0  ;;  %388 = vst.msk [vmem:[%s891_s28 + $0x14] sm:$0xf] %vm382_vm1, %v371_v42  ;;  %v320_v46 = vpop.f32.mrf.mxu1  ;;  %v455_v18 = vadd.f32 %v454_v4, %v453_v14 }
  0xa9   : > { %v309_v47 = vadd.f32 %v881_v20, %v308_v45  ;;  %391 = vst.msk [vmem:[%s891_s28 + $0x20] sm:$0xf] %vm382_vm1, %v374_v43  ;;  %v321_v48 = vadd.f32 %v881_v20, %v320_v46  ;;  %v329_v49 = vpop.f32.mrf.mxu2  ;;  %v341_v50 = vpop.f32.mrf.mxu3 }
  0xaa   : > { %v330_v51 = vadd.f32 %v881_v20, %v329_v49  ;;  %395 = vst.msk [vmem:[%s891_s28 + $0x30] sm:$0xf] %vm382_vm1, %v378_v44  ;;  %v342_v52 = vadd.f32 %v881_v20, %v341_v50  ;;  %v462_v49 = vsel %vm399_vm2, %v442_v32, 0.0 }
  0xab   : > { %v352_v53 = vmax.f32 %v309_v47, 0.0  ;;  %v927_v54 = vmax.f32 %v321_v48, 0.0 }
  0xac   : > { %v929_v55 = vmax.f32 %v330_v51, 0.0  ;;  %v931_v56 = vmax.f32 %v342_v52, 0.0 }
  0xad   : > { %v368_v58 = vpack.c.bf16 %v352_v53, %v352_v53  ;;  %v372_v59 = vpack.c.bf16 %v927_v54, %v927_v54  ;;  %v439_v63 = vmul.f32 %v352_v53, %v352_v53  ;;  %v403_v5 = vsel %vm399_vm2, %v352_v53, 0.0 }
  0xae   : > { %v375_v60 = vpack.c.bf16 %v929_v55, %v929_v55  ;;  %v379_v0 = vpack.c.bf16 %v931_v56, %v931_v56  ;;  %v404_v19 = vadd.f32 %v403_v5, %v402_v10  ;;  %v443_v41 = vmul.f32 %v927_v54, %v927_v54 }
  0xaf   : > { %385 = vst.msk [vmem:[%s891_s28 + $0x8] sm:$0xf] %vm382_vm1, %v368_v58  ;;  %v456_v15 = vsel %vm399_vm2, %v439_v63, 0.0  ;;  %v411_v38 = vsel %vm399_vm2, %v927_v54, 0.0  ;;  %v445_v58 = vmul.f32 %v905_v39, %v905_v39  ;;  %v415_v54 = vsel %vm399_vm2, %v905_v39, 0.0 }
  0xb0   : > { %v311_v2 = vpop.f32.mrf.mxu0  ;;  %389 = vst.msk [vmem:[%s891_s28 + $0x18] sm:$0xf] %vm382_vm1, %v372_v59  ;;  %v323_v3 = vpop.f32.mrf.mxu1  ;;  %v457_v28 = vadd.f32 %v456_v15, %v455_v18  ;;  %v464_v59 = vsel %vm399_vm2, %v443_v41, 0.0  ;;  %v446_v63 = vmul.f32 %v929_v55, %v929_v55  ;;  %v417_v4 = vsel %vm399_vm2, %v929_v55, 0.0 }
  0xb1   : > { %v312_v6 = vadd.f32 %v881_v20, %v311_v2  ;;  %392 = vst.msk [vmem:[%s891_s28 + $0x24] sm:$0xf] %vm382_vm1, %v375_v60  ;;  %v324_v7 = vadd.f32 %v881_v20, %v323_v3  ;;  %v332_v8 = vpop.f32.mrf.mxu2  ;;  %v344_v9 = vpop.f32.mrf.mxu3  ;;  %v468_v3 = vsel %vm399_vm2, %v445_v58, 0.0  ;;  %v450_v18 = vmul.f32 %v931_v56, %v931_v56 }
  0xb2   : > { %v333_v12 = vadd.f32 %v881_v20, %v332_v8  ;;  %396 = vst.msk [vmem:[%s891_s28 + $0x34] sm:$0xf] %vm382_vm1, %v379_v0  ;;  %v345_v13 = vadd.f32 %v881_v20, %v344_v9  ;;  %v470_v39 = vsel %vm399_vm2, %v446_v63, 0.0 }
  0xb3   : > { %v353_v16 = vmax.f32 %v312_v6, 0.0  ;;  %v357_v17 = vmax.f32 %v324_v7, 0.0 }
  0xb4   : > { %v360_v21 = vmax.f32 %v333_v12, 0.0  ;;  %v959_v22 = vmax.f32 %v345_v13, 0.0  ;;  %v449_v13 = vmul.f32 %v907_v40, %v907_v40 }
  0xb5   : > { %v369_v23 = vpack.c.bf16 %v353_v16, %v353_v16  ;;  %v405_v24 = vsel %vm399_vm2, %v353_v16, 0.0  ;;  %v440_v25 = vmul.f32 %v353_v16, %v353_v16  ;;  %v373_v27 = vpack.c.bf16 %v357_v17, %v357_v17 }
  0xb6   : > { %v406_v29 = vadd.f32 %v405_v24, %v404_v19  ;;  %v376_v30 = vpack.c.bf16 %v360_v21, %v360_v21  ;;  %v380_v34 = vpack.c.bf16 %v959_v22, %v959_v22  ;;  %v444_v42 = vmul.f32 %v357_v17, %v357_v17 }
  0xb7   : > { %386 = vst.msk [vmem:[%s891_s28 + $0xc] sm:$0xf] %vm382_vm1, %v369_v23  ;;  %v458_v33 = vsel %vm399_vm2, %v440_v25, 0.0  ;;  %v413_v50 = vsel %vm399_vm2, %v357_v17, 0.0  ;;  %v447_v5 = vmul.f32 %v360_v21, %v360_v21  ;;  %v419_v9 = vsel %vm399_vm2, %v360_v21, 0.0 }
  0xb8   : > { %v408_v35 = vadd.f32 %v407_v31, %v406_v29  ;;  %v459_v36 = vadd.f32 %v458_v33, %v457_v28  ;;  %390 = vst.msk [vmem:[%s891_s28 + $0x1c] sm:$0xf] %vm382_vm1, %v373_v27  ;;  %v423_v17 = vsel %vm399_vm2, %v907_v40, 0.0  ;;  %v476_v23 = vsel %vm399_vm2, %v449_v13, 0.0 }
  0xb9   : > { %393 = vst.msk [vmem:[%s891_s28 + $0x28] sm:$0xf] %vm382_vm1, %v376_v30  ;;  %v335_v43 = vpop.f32.mrf.mxu2  ;;  %v347_v44 = vpop.f32.mrf.mxu3  ;;  %v472_v14 = vsel %vm399_vm2, %v447_v5, 0.0  ;;  %v425_v24 = vsel %vm399_vm2, %v931_v56, 0.0  ;;  %v451_v25 = vmul.f32 %v959_v22, %v959_v22  ;;  %v478_v30 = vsel %vm399_vm2, %v450_v18, 0.0 }
  0xba   : > { %v461_v45 = vadd.f32 %v460_v37, %v459_v36  ;;  %v410_v46 = vadd.f32 %v409_v26, %v408_v35  ;;  %v336_v47 = vadd.f32 %v881_v20, %v335_v43  ;;  %397 = vst.msk [vmem:[%s891_s28 + $0x38] sm:$0xf] %vm382_vm1, %v380_v34  ;;  %v348_v48 = vadd.f32 %v881_v20, %v347_v44 }
  0xbb   : > { %v466_v20 = vsel %vm399_vm2, %v444_v42, 0.0  ;;  %v427_v40 = vsel %vm399_vm2, %v959_v22, 0.0  ;;  %v480_v34 = vsel %vm399_vm2, %v451_v25, 0.0  ;;  %v490_v43 = vlaneseq }
  0xbc   : > { %v412_v51 = vadd.f32 %v411_v38, %v410_v46  ;;  %v463_v52 = vadd.f32 %v462_v49, %v461_v45  ;;  %v361_v53 = vmax.f32 %v336_v47, 0.0  ;;  %v365_v57 = vmax.f32 %v348_v48, 0.0 }
  0xbd   : > { %v491_v47 = vshrl.u32 %v490_v43, 7 }
  0xbe   : > { %v465_v60 = vadd.f32 %v464_v59, %v463_v52  ;;  %v414_v61 = vadd.f32 %v413_v50, %v412_v51  ;;  %v377_v62 = vpack.c.bf16 %v361_v53, %v361_v53  ;;  %v381_v0 = vpack.c.bf16 %v365_v57, %v365_v57 }
  0xbf   : > { %v448_v6 = vmul.f32 %v361_v53, %v361_v53  ;;  %v421_v10 = vsel %vm399_vm2, %v361_v53, 0.0  ;;  %v452_v27 = vmul.f32 %v365_v57, %v365_v57  ;;  %v429_v31 = vsel %vm399_vm2, %v365_v57, 0.0 }
  0xc0   : > { %v416_v1 = vadd.f32 %v415_v54, %v414_v61  ;;  %v467_v2 = vadd.f32 %v466_v20, %v465_v60  ;;  %394 = vst.msk [vmem:[%s891_s28 + $0x2c] sm:$0xf] %vm382_vm1, %v377_v62  ;;  %vm492_vm3 = vcmp.eq.s32.totalorder %v491_v47, 0  ;;  %vm494_vm4 = vcmp.eq.s32.totalorder %v491_v47, 1 }
  0xc1   : > { %398 = vst.msk [vmem:[%s891_s28 + $0x3c] sm:$0xf] %vm382_vm1, %v381_v0  ;;  %v474_v55 = vsel %vm399_vm2, %v448_v6, 0.0  ;;  %v482_v56 = vsel %vm399_vm2, %v452_v27, 0.0 }
  0xc2   : > { %v469_v7 = vadd.f32 %v468_v3, %v467_v2  ;;  %v418_v8 = vadd.f32 %v417_v4, %v416_v1 }
  0xc4   : > { %v420_v11 = vadd.f32 %v419_v9, %v418_v8  ;;  %v471_v12 = vadd.f32 %v470_v39, %v469_v7 }
  0xc6   : > { %v473_v15 = vadd.f32 %v472_v14, %v471_v12  ;;  %v422_v16 = vadd.f32 %v421_v10, %v420_v11 }
  0xc8   : > { %v424_v19 = vadd.f32 %v423_v17, %v422_v16  ;;  %v475_v21 = vadd.f32 %v474_v55, %v473_v15 }
  0xca   : > { %v477_v28 = vadd.f32 %v476_v23, %v475_v21  ;;  %v426_v29 = vadd.f32 %v425_v24, %v424_v19 }
  0xcc   : > { %v428_v32 = vadd.f32 %v427_v40, %v426_v29  ;;  %v479_v33 = vadd.f32 %v478_v30, %v477_v28 }
  0xce   : > { %v481_v35 = vadd.f32 %v480_v34, %v479_v33  ;;  %v430_v36 = vadd.f32 %v429_v31, %v428_v32 }
  0xd0   : > { %v431_v37 = vrot.slane %v430_v36, 4  ;;  %v483_v26 = vadd.f32 %v482_v56, %v481_v35 }
  0xd2   : > { %v432_v41 = vadd.f32 %v431_v37, %v430_v36  ;;  %v484_v42 = vrot.slane %v483_v26, 4 }
  0xd4   : > { %v433_v44 = vrot.slane %v432_v41, 2  ;;  %v485_v45 = vadd.f32 %v484_v42, %v483_v26 }
  0xd6   : > { %v434_v22 = vadd.f32 %v433_v44, %v432_v41  ;;  %v486_v46 = vrot.slane %v485_v45, 2 }
  0xd8   : > { %v435_v48 = vrot.slane %v434_v22, 1  ;;  %v487_v49 = vadd.f32 %v486_v46, %v485_v45 }
  0xda   : > { %v436_v38 = vadd.f32 %v435_v48, %v434_v22  ;;  %v488_v50 = vrot.slane %v487_v49, 1 }
  0xdc   : > { %v489_v51 = vadd.f32 %v488_v50, %v487_v49  ;;  %v493_v52 = vsel %vm492_vm3, %v436_v38, 0.0 }
  0xde   : > { %v495_v53 = vsel %vm494_vm4, %v489_v51, 0.0 }
  0xdf   : > { %v496_v57 = vadd.f32 %v495_v53, %v493_v52 }
  0xe1   : > { %497 = vst.msk [vmem:[%s199_s9] sm:$0xff] %vm399_vm2, %v496_v57 }
  0xe2   : > { %715 = shalt.err (!%p712_p3)
}
  0xe3   : > { %648 = dma.vmem_to_hbm [thread:$0]  (%p815_p5), %s521_s10, 128, %s523_s11, %s504_s19  }
  0xe4 PF: > { %p654_p4 = scmp.ge.s32.totalorder %s750_s18, 2  ;;  %s542_s28 = sand.u32 1, %s738_s15  }
  0xe5   : > { %s543_s29 = scalar_lea.sflag [#allocation3], %s542_s28 }
  0xe6   : > { %p651_p7 = pnand %p654_p4, %p819_p6 }
  0xe8   : > { %p652_p8 = pneg %p651_p7 }
  0xea   : > { %733 = dma.done.wait (%p652_p8), %s543_s29, 128  }
  0xeb   : > { %735 = vsyncadd (%p652_p8), %s543_s29, 4294967168  ;;  %p15_p9 = scmp.ge.s32.totalorder %s802_s21, 6   ;;  %s1065_s15 = smov %s742_s16 }
  0xec   : > { %s1066_s16 = smov %s746_s17  ;;  %s1067_s17 = smov %s813_s24 }
  0xed   : > { %s1068_s18 = smov %s802_s21  ;;  %17 = sbr.rel (!%p15_p9) target bundleno = 3 (0x3), region = 79 }
  0xf2   :  { %549 = vsyncpa [#allocation3], 1 }
  0xf3   :  { %551 = vsyncpa [#allocation3 + $0x1], 1 }

</bundles_post_ra>
